<compile_context>
chip_gen: v6e
topology: v6e:2x2x1
jax: 0.10.0
libtpu: 0.0.40
codegen_flags: <defaults>
</compile_context>

<pallas_src>
import functools

import jax
import jax.numpy as jnp
from jax.experimental import pallas as pl
from jax.experimental.pallas import tpu as pltpu


def _round_up(v, m):
    return (v + m - 1) // m * m


def _choose_tiles(n):
    """(padded_n, row_tile).  The contraction axis is never tiled."""
    npad = _round_up(n, 8)
    if npad <= 512:
        return npad, npad                  # single row tile at toy sizes
    npad = _round_up(n, 512)
    return npad, 512                       # 512 x N bf16 slab (8 MiB at N=8192)


def _vmem_limit_bytes(npad, tm, in_ch, hid, out_ch, ppad):
    bf16, f32 = 2, 4
    dbl = 2  # default double-buffering on every pipelined input/output block
    blocks = dbl * (
        tm * npad * bf16                       # A_hat row slab
        + npad * in_ch * bf16                  # X (resident)
        + ppad * in_ch * bf16                  # target embeddings (resident)
        + in_ch * hid * bf16 + hid * f32       # W_conv1 / b_conv1
        + hid * out_ch * bf16 + out_ch * f32   # W_conv2 / b_conv2
        + out_ch * hid * bf16                  # MLP W1 (source half)
        + in_ch * hid * bf16                   # MLP W1 (target half)
        + 2 * hid * f32 + f32                  # MLP b1 / w2-row / b2
        + ppad * f32                           # output column
    )
    scratch = (npad * out_ch * bf16            # HW2
               + npad * out_ch * f32           # Z
               + ppad * out_ch * f32)          # gathered source embeddings
    est = blocks + scratch + (4 << 20)         # headroom for mosaic internals
    return int(min(max(est, 24 << 20), 56 << 20))


# ----------------------------------------------------------------------------
# Fused Pallas kernel: conv1 -> relu -> conv2 -> src gather -> link MLP
# ----------------------------------------------------------------------------
def _fused_gcn_link_kernel(
    src_idx_ref,                                   # scalar prefetch (SMEM)
    a_ref, x_ref, tgt_ref,
    w1_ref, b1_ref, w2_ref, b2_ref,
    w1s_ref, w1t_ref, bm1_ref, wm2_ref, bm2_ref,
    o_ref,
    hw2_ref, z_ref, src_ref,
    *, tm, n_row_tiles, ppad,
):
    layer = pl.program_id(0)
    i = pl.program_id(1)
    row0 = pl.multiple_of(i * tm, 8)

    # Output block has a constant index (revisited across the whole grid);
    # make sure it can never be written back uninitialized.
    @pl.when((layer == 0) & (i == 0))
    def _init_out():
        o_ref[...] = jnp.zeros_like(o_ref)

    # ---- layer 0: HW2[rows] = relu((A @ X)[rows] @ W1 + b1) @ W2 ------------
    @pl.when(layer == 0)
    def _conv1():
        ax = jnp.dot(a_ref[...], x_ref[...],                 # bf16 x bf16
                     preferred_element_type=jnp.float32)     # f32 accumulate
        h = jnp.maximum(
            jnp.dot(ax.astype(jnp.bfloat16), w1_ref[...],
                    preferred_element_type=jnp.float32) + b1_ref[...],
            0.0)
        hw2_ref[pl.ds(row0, tm), :] = jnp.dot(
            h.astype(jnp.bfloat16), w2_ref[...],
            preferred_element_type=jnp.float32).astype(jnp.bfloat16)

    # ---- layer 1: Z[rows] = (A @ HW2)[rows] + b2 ----------------------------
    @pl.when(layer == 1)
    def _conv2():
        z_ref[pl.ds(row0, tm), :] = jnp.dot(
            a_ref[...], hw2_ref[...],
            preferred_element_type=jnp.float32) + b2_ref[...]

    # ---- final grid step: scalar-prefetched source gather + link MLP --------
    @pl.when((layer == 1) & (i == n_row_tiles - 1))
    def _link_mlp():
        def gather(pp, carry):
            idx = src_idx_ref[pp]                            # SMEM scalar read
            src_ref[pl.ds(pp, 1), :] = z_ref[pl.ds(idx, 1), :]
            return carry

        jax.lax.fori_loop(0, ppad, gather, 0, unroll=ppad <= 64)

        # Linear1 on concat([src, tgt]) == split matmul over the two W1 halves.
        hm = jnp.maximum(
            jnp.dot(src_ref[...].astype(jnp.bfloat16), w1s_ref[...],
                    preferred_element_type=jnp.float32)
            + jnp.dot(tgt_ref[...], w1t_ref[...],
                      preferred_element_type=jnp.float32)
            + bm1_ref[...],
            0.0)
        # (hid, 1) matmul replaced by a lane reduction (VPU/XLU, MXU-free).
        logits = jnp.sum(hm * wm2_ref[...], axis=-1, keepdims=True) + bm2_ref[...]
        # TODO(synk): at large P, pack logits lane-dense as (P/128, 128)
        # instead of a (P, 1) column to keep stores unmasked.
        o_ref[...] = jax.nn.sigmoid(logits)


# ----------------------------------------------------------------------------
# Glue (plain JAX): adjacency normalisation, padding, wrapper
# ----------------------------------------------------------------------------
def build_norm_adj(edge_index, num_nodes):
    """Dense D^-1/2 (A + I) D^-1/2; messages flow edge_index[0] -> edge_index[1].

    Assumes the edge list has no pre-existing self loops and no duplicates
    (matches the synthetic driver; PyG gcn_norm differs otherwise).
    """
    src = edge_index[0]
    dst = edge_index[1]
    a = jnp.zeros((num_nodes, num_nodes), jnp.float32).at[dst, src].add(1.0)
    a = a + jnp.eye(num_nodes, dtype=jnp.float32)
    deg = jnp.sum(a, axis=1)
    dinv = jax.lax.rsqrt(deg)
    return dinv[:, None] * a * dinv[None, :]


def gcn_link_predictor_forward(params, x, edge_index, node_pairs):
    n, in_ch = x.shape
    hid = params["w_conv1"].shape[1]
    out_ch = params["w_conv2"].shape[1]
    p = node_pairs.shape[0]

    npad, tm = _choose_tiles(n)
    n_row_tiles = npad // tm
    ppad = _round_up(p, 8)

    a_hat = build_norm_adj(edge_index, n)

    # bf16 MXU operands (f32 accumulation in-kernel); zero-pad to tiles.
    a_p = jnp.zeros((npad, npad), jnp.float32).at[:n, :n].set(a_hat)
    a_p = a_p.astype(jnp.bfloat16)
    x_p = jnp.zeros((npad, in_ch), jnp.float32).at[:n, :].set(x)
    x_p = x_p.astype(jnp.bfloat16)

    # Target gather only touches the raw input X -> do it in the wrapper.
    tgt = jnp.zeros((ppad, in_ch), jnp.float32).at[:p, :].set(x[node_pairs[:, 1]])
    tgt = tgt.astype(jnp.bfloat16)

    # Source gather happens in-kernel on the VMEM-resident Z via these
    # scalar-prefetched indices (padding rows read a valid row 0, then sliced).
    src_idx = jnp.zeros((ppad,), jnp.int32).at[:p].set(
        node_pairs[:, 0].astype(jnp.int32))

    w1 = params["w_conv1"].astype(jnp.bfloat16)
    b1 = params["b_conv1"].reshape(1, hid).astype(jnp.float32)
    w2 = params["w_conv2"].astype(jnp.bfloat16)
    b2 = params["b_conv2"].reshape(1, out_ch).astype(jnp.float32)
    w1s = params["w1_src"].astype(jnp.bfloat16)
    w1t = params["w1_tgt"].astype(jnp.bfloat16)
    bm1 = params["b1"].reshape(1, hid).astype(jnp.float32)
    wm2 = params["w2"].reshape(1, hid).astype(jnp.float32)
    bm2 = params["b2"].reshape(1, 1).astype(jnp.float32)

    kernel = functools.partial(
        _fused_gcn_link_kernel, tm=tm, n_row_tiles=n_row_tiles, ppad=ppad)

    resident = lambda l, i, src_idx: (0, 0)   # constant-index VMEM residents

    grid_spec = pltpu.PrefetchScalarGridSpec(
        num_scalar_prefetch=1,
        grid=(2, n_row_tiles),
        in_specs=[
            pl.BlockSpec((tm, npad), lambda l, i, src_idx: (i, 0)),  # A_hat slab
            pl.BlockSpec((npad, in_ch), resident),                   # X
            pl.BlockSpec((ppad, in_ch), resident),                   # target emb
            pl.BlockSpec((in_ch, hid), resident),                    # W_conv1
            pl.BlockSpec((1, hid), resident),                        # b_conv1
            pl.BlockSpec((hid, out_ch), resident),                   # W_conv2
            pl.BlockSpec((1, out_ch), resident),                     # b_conv2
            pl.BlockSpec((out_ch, hid), resident),                   # MLP W1 (src)
            pl.BlockSpec((in_ch, hid), resident),                    # MLP W1 (tgt)
            pl.BlockSpec((1, hid), resident),                        # MLP b1
            pl.BlockSpec((1, hid), resident),                        # MLP w2 row
            pl.BlockSpec((1, 1), resident),                          # MLP b2
        ],
        out_specs=pl.BlockSpec((ppad, 1), resident),
        scratch_shapes=[
            pltpu.VMEM((npad, out_ch), jnp.bfloat16),  # HW2 = relu(conv1) @ W2
            pltpu.VMEM((npad, out_ch), jnp.float32),   # Z   = conv2 output
            pltpu.VMEM((ppad, out_ch), jnp.float32),   # gathered source emb
        ],
    )

    out = pl.pallas_call(
        kernel,
        out_shape=jax.ShapeDtypeStruct((ppad, 1), jnp.float32),
        grid_spec=grid_spec,
        compiler_params=pltpu.CompilerParams(
            # Row axis stays "arbitrary": layer-1 row tiles read layer-0
            # results of ALL rows through the shared VMEM scratch.
            dimension_semantics=("arbitrary", "arbitrary"),
            vmem_limit_bytes=_vmem_limit_bytes(npad, tm, in_ch, hid, out_ch, ppad),
        ),
    )(src_idx, a_p, x_p, tgt, w1, b1, w2, b2, w1s, w1t, bm1, wm2, bm2)

    return out[:p, :]


# ----------------------------------------------------------------------------
# Pure-JAX reference (f32) for a tolerance check
# ----------------------------------------------------------------------------
def _reference_forward(params, x, edge_index, node_pairs):
    a_hat = build_norm_adj(edge_index, x.shape[0])
    h = jnp.maximum(a_hat @ x @ params["w_conv1"] + params["b_conv1"], 0.0)
    z = a_hat @ h @ params["w_conv2"] + params["b_conv2"]
    src = z[node_pairs[:, 0]]
    tgt = x[node_pairs[:, 1]]
    hm = jnp.maximum(src @ params["w1_src"] + tgt @ params["w1_tgt"] + params["b1"], 0.0)
    return jax.nn.sigmoid(hm @ params["w2"] + params["b2"])


# ----------------------------------------------------------------------------
# Driver
# ----------------------------------------------------------------------------
if __name__ == "__main__":
    n_nodes, in_ch, hid_ch, out_ch = 64, 16, 32, 16
    n_edges, n_pairs = 128, 16

    key = jax.random.PRNGKey(0)
    keys = jax.random.split(key, 10)

    x = jax.random.normal(keys[0], (n_nodes, in_ch), jnp.float32)
    src = jax.random.randint(keys[1], (n_edges,), 0, n_nodes, jnp.int32)
    offs = jax.random.randint(keys[2], (n_edges,), 1, n_nodes, jnp.int32)
    dst = (src + offs) % n_nodes                              # no self loops
    edge_index = jnp.stack([src, dst], axis=0)
    node_pairs = jax.random.randint(keys[3], (n_pairs, 2), 0, n_nodes, jnp.int32)

    # Deterministic parameter init (synthetic, not a checkpoint load).
    params = {
        "w_conv1": 0.1 * jax.random.normal(keys[4], (in_ch, hid_ch), jnp.float32),
        "b_conv1": jnp.zeros((hid_ch,), jnp.float32),
        "w_conv2": 0.1 * jax.random.normal(keys[5], (hid_ch, out_ch), jnp.float32),
        "b_conv2": jnp.zeros((out_ch,), jnp.float32),
        # Linear(in_ch + out_ch, hid_ch) split into source(out_ch)/target(in_ch)
        "w1_src": 0.1 * jax.random.normal(keys[6], (out_ch, hid_ch), jnp.float32),
        "w1_tgt": 0.1 * jax.random.normal(keys[7], (in_ch, hid_ch), jnp.float32),
        "b1": jnp.zeros((hid_ch,), jnp.float32),
        "w2": 0.1 * jax.random.normal(keys[8], (hid_ch, 1), jnp.float32),
        "b2": jnp.zeros((1,), jnp.float32),
    }

    out = jax.jit(gcn_link_predictor_forward)(params, x, edge_index, node_pairs)
    jax.block_until_ready(out)
    assert out.shape == (n_pairs, 1) and out.dtype == jnp.float32

    ref = _reference_forward(params, x, edge_index, node_pairs)
    assert jnp.allclose(out, ref, atol=5e-2), float(jnp.max(jnp.abs(out - ref)))
    print("KERNEL_OK")
</pallas_src>

<mosaic_0001>
module attributes {stable_mosaic.version = 11 : i64} {
  func.func private @main(%arg0: i32) attributes {dimension_semantics = [#tpu.dimension_semantics<core_parallel>], iteration_bounds = array<i64: 2>, tpu.core_type = #tpu.core_type<sc_scalar_subcore>, window_params = []} {
    return
  }
}

module attributes {stable_mosaic.version = 11 : i64} {
  func.func private @main(%arg0: i32) attributes {dimension_semantics = [#tpu.dimension_semantics<core_parallel>], iteration_bounds = array<i64: 2>, tpu.core_type = #tpu.core_type<sc_scalar_subcore>, window_params = []} {
    return
  }
}

module attributes {stable_mosaic.version = 11 : i64} {
  func.func @_fused_gcn_link_kernel(%arg0: i32, %arg1: i32, %arg2: memref<16xi32, #tpu.memory_space<smem>>, %arg3: memref<64x64xbf16, #tpu.memory_space<vmem>>, %arg4: memref<64x16xbf16, #tpu.memory_space<vmem>>, %arg5: memref<16x16xbf16, #tpu.memory_space<vmem>>, %arg6: memref<16x32xbf16, #tpu.memory_space<vmem>>, %arg7: memref<1x32xf32, #tpu.memory_space<vmem>>, %arg8: memref<32x16xbf16, #tpu.memory_space<vmem>>, %arg9: memref<1x16xf32, #tpu.memory_space<vmem>>, %arg10: memref<16x32xbf16, #tpu.memory_space<vmem>>, %arg11: memref<16x32xbf16, #tpu.memory_space<vmem>>, %arg12: memref<1x32xf32, #tpu.memory_space<vmem>>, %arg13: memref<1x32xf32, #tpu.memory_space<vmem>>, %arg14: memref<1x1xf32, #tpu.memory_space<vmem>>, %arg15: memref<16x1xf32, #tpu.memory_space<vmem>>, %arg16: memref<64x16xbf16, #tpu.memory_space<vmem>>, %arg17: memref<64x16xf32, #tpu.memory_space<vmem>>, %arg18: memref<16x16xf32, #tpu.memory_space<vmem>>) attributes {dimension_semantics = [#tpu.dimension_semantics<arbitrary>, #tpu.dimension_semantics<arbitrary>], iteration_bounds = array<i64: 2, 1>, scalar_prefetch = 1 : i64, scratch_operands = 3 : i64, tpu.core_type = #tpu.core_type<tc>, window_params = [{transform_indices = @transform_0, window_bounds = array<i64: 64, 64>}, {pipeline_mode = #tpu.pipeline_mode<synchronous>, transform_indices = @transform_1, window_bounds = array<i64: 64, 16>}, {pipeline_mode = #tpu.pipeline_mode<synchronous>, transform_indices = @transform_2, window_bounds = array<i64: 16, 16>}, {pipeline_mode = #tpu.pipeline_mode<synchronous>, transform_indices = @transform_3, window_bounds = array<i64: 16, 32>}, {pipeline_mode = #tpu.pipeline_mode<synchronous>, transform_indices = @transform_4, window_bounds = array<i64: 1, 32>}, {pipeline_mode = #tpu.pipeline_mode<synchronous>, transform_indices = @transform_5, window_bounds = array<i64: 32, 16>}, {pipeline_mode = #tpu.pipeline_mode<synchronous>, transform_indices = @transform_6, window_bounds = array<i64: 1, 16>}, {pipeline_mode = #tpu.pipeline_mode<synchronous>, transform_indices = @transform_7, window_bounds = array<i64: 16, 32>}, {pipeline_mode = #tpu.pipeline_mode<synchronous>, transform_indices = @transform_8, window_bounds = array<i64: 16, 32>}, {pipeline_mode = #tpu.pipeline_mode<synchronous>, transform_indices = @transform_9, window_bounds = array<i64: 1, 32>}, {pipeline_mode = #tpu.pipeline_mode<synchronous>, transform_indices = @transform_10, window_bounds = array<i64: 1, 32>}, {pipeline_mode = #tpu.pipeline_mode<synchronous>, transform_indices = @transform_11, window_bounds = array<i64: 1, 1>}, {pipeline_mode = #tpu.pipeline_mode<synchronous>, transform_indices = @transform_12, window_bounds = array<i64: 16, 1>}]} {
    %c64_i32 = arith.constant 64 : i32
    %0 = arith.muli %arg1, %c64_i32 : i32
    %1 = tpu.assume_multiple %0, 8 : i32
    %c0_i32 = arith.constant 0 : i32
    %2 = arith.cmpi eq, %arg0, %c0_i32 : i32
    %c0_i32_0 = arith.constant 0 : i32
    %3 = arith.cmpi eq, %arg1, %c0_i32_0 : i32
    %4 = arith.andi %2, %3 : i1
    %5 = arith.extui %4 : i1 to i32
    %c0_i32_1 = arith.constant 0 : i32
    %6 = arith.cmpi ne, %5, %c0_i32_1 : i32
    scf.if %6 {
      %cst = arith.constant 0.000000e+00 : f32
      %18 = vector.broadcast %cst : f32 to vector<16x1xf32>
      %c0 = arith.constant 0 : index
      %c0_8 = arith.constant 0 : index
      %19 = vector.load %arg15[%c0, %c0_8] : memref<16x1xf32, #tpu.memory_space<vmem>>, vector<16x1xf32>
      tpu.vector_store %arg15[%c0, %c0_8], %18 {strides = array<i32>} : memref<16x1xf32, #tpu.memory_space<vmem>>, vector<16x1xf32>,
    } else {
    }
    %c0_i32_2 = arith.constant 0 : i32
    %7 = arith.cmpi eq, %arg0, %c0_i32_2 : i32
    %8 = arith.extui %7 : i1 to i32
    %c0_i32_3 = arith.constant 0 : i32
    %9 = arith.cmpi ne, %8, %c0_i32_3 : i32
    scf.if %9 {
      %c0 = arith.constant 0 : index
      %c0_8 = arith.constant 0 : index
      %18 = vector.load %arg3[%c0, %c0_8] : memref<64x64xbf16, #tpu.memory_space<vmem>>, vector<64x64xbf16>
      %c0_9 = arith.constant 0 : index
      %c0_10 = arith.constant 0 : index
      %19 = vector.load %arg4[%c0_9, %c0_10] : memref<64x16xbf16, #tpu.memory_space<vmem>>, vector<64x16xbf16>
      %cst = arith.constant dense<0.000000e+00> : vector<64x16xf32>
      %20 = tpu.matmul %18, %19, %cst {dimension_numbers = #tpu.dot_dimension_numbers<[1], [0], [0], [1], [0, 0, 1, 1], [], []>} : vector<64x64xbf16>, vector<64x16xbf16>, vector<64x16xf32> -> vector<64x16xf32>
      %21 = arith.truncf %20 : vector<64x16xf32> to vector<64x16xbf16>
      %c0_11 = arith.constant 0 : index
      %c0_12 = arith.constant 0 : index
      %22 = vector.load %arg6[%c0_11, %c0_12] : memref<16x32xbf16, #tpu.memory_space<vmem>>, vector<16x32xbf16>
      %cst_13 = arith.constant dense<0.000000e+00> : vector<64x32xf32>
      %23 = tpu.matmul %21, %22, %cst_13 {dimension_numbers = #tpu.dot_dimension_numbers<[1], [0], [0], [1], [0, 0, 1, 1], [], []>} : vector<64x16xbf16>, vector<16x32xbf16>, vector<64x32xf32> -> vector<64x32xf32>
      %c0_14 = arith.constant 0 : index
      %c0_15 = arith.constant 0 : index
      %24 = vector.load %arg7[%c0_14, %c0_15] : memref<1x32xf32, #tpu.memory_space<vmem>>, vector<1x32xf32>
      %25 = vector.broadcast %24 : vector<1x32xf32> to vector<64x32xf32>
      %26 = arith.addf %23, %25 : vector<64x32xf32>
      %cst_16 = arith.constant 0.000000e+00 : f32
      %27 = vector.broadcast %cst_16 : f32 to vector<64x32xf32>
      %28 = arith.maximumf %26, %27 : vector<64x32xf32>
      %29 = arith.truncf %28 : vector<64x32xf32> to vector<64x32xbf16>
      %c0_17 = arith.constant 0 : index
      %c0_18 = arith.constant 0 : index
      %30 = vector.load %arg8[%c0_17, %c0_18] : memref<32x16xbf16, #tpu.memory_space<vmem>>, vector<32x16xbf16>
      %cst_19 = arith.constant dense<0.000000e+00> : vector<64x16xf32>
      %31 = tpu.matmul %29, %30, %cst_19 {dimension_numbers = #tpu.dot_dimension_numbers<[1], [0], [0], [1], [0, 0, 1, 1], [], []>} : vector<64x32xbf16>, vector<32x16xbf16>, vector<64x16xf32> -> vector<64x16xf32>
      %32 = arith.truncf %31 : vector<64x16xf32> to vector<64x16xbf16>
      %33 = arith.index_cast %1 : i32 to index
      %c0_20 = arith.constant 0 : index
      %34 = vector.load %arg16[%33, %c0_20] : memref<64x16xbf16, #tpu.memory_space<vmem>>, vector<64x16xbf16>
      tpu.vector_store %arg16[%33, %c0_20], %32 {strides = array<i32>} : memref<64x16xbf16, #tpu.memory_space<vmem>>, vector<64x16xbf16>,
    } else {
    }
    %c1_i32 = arith.constant 1 : i32
    %10 = arith.cmpi eq, %arg0, %c1_i32 : i32
    %11 = arith.extui %10 : i1 to i32
    %c0_i32_4 = arith.constant 0 : i32
    %12 = arith.cmpi ne, %11, %c0_i32_4 : i32
    scf.if %12 {
      %c0 = arith.constant 0 : index
      %c0_8 = arith.constant 0 : index
      %18 = vector.load %arg3[%c0, %c0_8] : memref<64x64xbf16, #tpu.memory_space<vmem>>, vector<64x64xbf16>
      %c0_9 = arith.constant 0 : index
      %c0_10 = arith.constant 0 : index
      %19 = vector.load %arg16[%c0_9, %c0_10] : memref<64x16xbf16, #tpu.memory_space<vmem>>, vector<64x16xbf16>
      %cst = arith.constant dense<0.000000e+00> : vector<64x16xf32>
      %20 = tpu.matmul %18, %19, %cst {dimension_numbers = #tpu.dot_dimension_numbers<[1], [0], [0], [1], [0, 0, 1, 1], [], []>} : vector<64x64xbf16>, vector<64x16xbf16>, vector<64x16xf32> -> vector<64x16xf32>
      %c0_11 = arith.constant 0 : index
      %c0_12 = arith.constant 0 : index
      %21 = vector.load %arg9[%c0_11, %c0_12] : memref<1x16xf32, #tpu.memory_space<vmem>>, vector<1x16xf32>
      %22 = vector.broadcast %21 : vector<1x16xf32> to vector<64x16xf32>
      %23 = arith.addf %20, %22 : vector<64x16xf32>
      %24 = arith.index_cast %1 : i32 to index
      %c0_13 = arith.constant 0 : index
      %25 = vector.load %arg17[%24, %c0_13] : memref<64x16xf32, #tpu.memory_space<vmem>>, vector<64x16xf32>
      tpu.vector_store %arg17[%24, %c0_13], %23 {strides = array<i32>} : memref<64x16xf32, #tpu.memory_space<vmem>>, vector<64x16xf32>,
    } else {
    }
    %c1_i32_5 = arith.constant 1 : i32
    %13 = arith.cmpi eq, %arg0, %c1_i32_5 : i32
    %c0_i32_6 = arith.constant 0 : i32
    %14 = arith.cmpi eq, %arg1, %c0_i32_6 : i32
    %15 = arith.andi %13, %14 : i1
    %16 = arith.extui %15 : i1 to i32
    %c0_i32_7 = arith.constant 0 : i32
    %17 = arith.cmpi ne, %16, %c0_i32_7 : i32
    scf.if %17 {
      %c0_i32_8 = arith.constant 0 : i32
      %18 = arith.index_cast %c0_i32_8 : i32 to index
      %19 = memref.load %arg2[%18] : memref<16xi32, #tpu.memory_space<smem>>
      %20 = arith.index_cast %19 : i32 to index
      %c0 = arith.constant 0 : index
      %21 = vector.load %arg17[%20, %c0] : memref<64x16xf32, #tpu.memory_space<vmem>>, vector<1x16xf32>
      %22 = arith.index_cast %c0_i32_8 : i32 to index
      %c0_9 = arith.constant 0 : index
      %23 = vector.load %arg18[%22, %c0_9] : memref<16x16xf32, #tpu.memory_space<vmem>>, vector<1x16xf32>
      tpu.vector_store %arg18[%22, %c0_9], %21 {strides = array<i32>} : memref<16x16xf32, #tpu.memory_space<vmem>>, vector<1x16xf32>,
      %c1_i32_10 = arith.constant 1 : i32
      %24 = arith.index_cast %c1_i32_10 : i32 to index
      %25 = memref.load %arg2[%24] : memref<16xi32, #tpu.memory_space<smem>>
      %26 = arith.index_cast %25 : i32 to index
      %c0_11 = arith.constant 0 : index
      %27 = vector.load %arg17[%26, %c0_11] : memref<64x16xf32, #tpu.memory_space<vmem>>, vector<1x16xf32>
      %28 = arith.index_cast %c1_i32_10 : i32 to index
      %c0_12 = arith.constant 0 : index
      %29 = vector.load %arg18[%28, %c0_12] : memref<16x16xf32, #tpu.memory_space<vmem>>, vector<1x16xf32>
      tpu.vector_store %arg18[%28, %c0_12], %27 {strides = array<i32>} : memref<16x16xf32, #tpu.memory_space<vmem>>, vector<1x16xf32>,
      %c2_i32 = arith.constant 2 : i32
      %30 = arith.index_cast %c2_i32 : i32 to index
      %31 = memref.load %arg2[%30] : memref<16xi32, #tpu.memory_space<smem>>
      %32 = arith.index_cast %31 : i32 to index
      %c0_13 = arith.constant 0 : index
      %33 = vector.load %arg17[%32, %c0_13] : memref<64x16xf32, #tpu.memory_space<vmem>>, vector<1x16xf32>
      %34 = arith.index_cast %c2_i32 : i32 to index
      %c0_14 = arith.constant 0 : index
      %35 = vector.load %arg18[%34, %c0_14] : memref<16x16xf32, #tpu.memory_space<vmem>>, vector<1x16xf32>
      tpu.vector_store %arg18[%34, %c0_14], %33 {strides = array<i32>} : memref<16x16xf32, #tpu.memory_space<vmem>>, vector<1x16xf32>,
      %c3_i32 = arith.constant 3 : i32
      %36 = arith.index_cast %c3_i32 : i32 to index
      %37 = memref.load %arg2[%36] : memref<16xi32, #tpu.memory_space<smem>>
      %38 = arith.index_cast %37 : i32 to index
      %c0_15 = arith.constant 0 : index
      %39 = vector.load %arg17[%38, %c0_15] : memref<64x16xf32, #tpu.memory_space<vmem>>, vector<1x16xf32>
      %40 = arith.index_cast %c3_i32 : i32 to index
      %c0_16 = arith.constant 0 : index
      %41 = vector.load %arg18[%40, %c0_16] : memref<16x16xf32, #tpu.memory_space<vmem>>, vector<1x16xf32>
      tpu.vector_store %arg18[%40, %c0_16], %39 {strides = array<i32>} : memref<16x16xf32, #tpu.memory_space<vmem>>, vector<1x16xf32>,
      %c4_i32 = arith.constant 4 : i32
      %42 = arith.index_cast %c4_i32 : i32 to index
      %43 = memref.load %arg2[%42] : memref<16xi32, #tpu.memory_space<smem>>
      %44 = arith.index_cast %43 : i32 to index
      %c0_17 = arith.constant 0 : index
      %45 = vector.load %arg17[%44, %c0_17] : memref<64x16xf32, #tpu.memory_space<vmem>>, vector<1x16xf32>
      %46 = arith.index_cast %c4_i32 : i32 to index
      %c0_18 = arith.constant 0 : index
      %47 = vector.load %arg18[%46, %c0_18] : memref<16x16xf32, #tpu.memory_space<vmem>>, vector<1x16xf32>
      tpu.vector_store %arg18[%46, %c0_18], %45 {strides = array<i32>} : memref<16x16xf32, #tpu.memory_space<vmem>>, vector<1x16xf32>,
      %c5_i32 = arith.constant 5 : i32
      %48 = arith.index_cast %c5_i32 : i32 to index
      %49 = memref.load %arg2[%48] : memref<16xi32, #tpu.memory_space<smem>>
      %50 = arith.index_cast %49 : i32 to index
      %c0_19 = arith.constant 0 : index
      %51 = vector.load %arg17[%50, %c0_19] : memref<64x16xf32, #tpu.memory_space<vmem>>, vector<1x16xf32>
      %52 = arith.index_cast %c5_i32 : i32 to index
      %c0_20 = arith.constant 0 : index
      %53 = vector.load %arg18[%52, %c0_20] : memref<16x16xf32, #tpu.memory_space<vmem>>, vector<1x16xf32>
      tpu.vector_store %arg18[%52, %c0_20], %51 {strides = array<i32>} : memref<16x16xf32, #tpu.memory_space<vmem>>, vector<1x16xf32>,
      %c6_i32 = arith.constant 6 : i32
      %54 = arith.index_cast %c6_i32 : i32 to index
      %55 = memref.load %arg2[%54] : memref<16xi32, #tpu.memory_space<smem>>
      %56 = arith.index_cast %55 : i32 to index
      %c0_21 = arith.constant 0 : index
      %57 = vector.load %arg17[%56, %c0_21] : memref<64x16xf32, #tpu.memory_space<vmem>>, vector<1x16xf32>
      %58 = arith.index_cast %c6_i32 : i32 to index
      %c0_22 = arith.constant 0 : index
      %59 = vector.load %arg18[%58, %c0_22] : memref<16x16xf32, #tpu.memory_space<vmem>>, vector<1x16xf32>
      tpu.vector_store %arg18[%58, %c0_22], %57 {strides = array<i32>} : memref<16x16xf32, #tpu.memory_space<vmem>>, vector<1x16xf32>,
      %c7_i32 = arith.constant 7 : i32
      %60 = arith.index_cast %c7_i32 : i32 to index
      %61 = memref.load %arg2[%60] : memref<16xi32, #tpu.memory_space<smem>>
      %62 = arith.index_cast %61 : i32 to index
      %c0_23 = arith.constant 0 : index
      %63 = vector.load %arg17[%62, %c0_23] : memref<64x16xf32, #tpu.memory_space<vmem>>, vector<1x16xf32>
      %64 = arith.index_cast %c7_i32 : i32 to index
      %c0_24 = arith.constant 0 : index
      %65 = vector.load %arg18[%64, %c0_24] : memref<16x16xf32, #tpu.memory_space<vmem>>, vector<1x16xf32>
      tpu.vector_store %arg18[%64, %c0_24], %63 {strides = array<i32>} : memref<16x16xf32, #tpu.memory_space<vmem>>, vector<1x16xf32>,
      %c8_i32 = arith.constant 8 : i32
      %66 = arith.index_cast %c8_i32 : i32 to index
      %67 = memref.load %arg2[%66] : memref<16xi32, #tpu.memory_space<smem>>
      %68 = arith.index_cast %67 : i32 to index
      %c0_25 = arith.constant 0 : index
      %69 = vector.load %arg17[%68, %c0_25] : memref<64x16xf32, #tpu.memory_space<vmem>>, vector<1x16xf32>
      %70 = arith.index_cast %c8_i32 : i32 to index
      %c0_26 = arith.constant 0 : index
      %71 = vector.load %arg18[%70, %c0_26] : memref<16x16xf32, #tpu.memory_space<vmem>>, vector<1x16xf32>
      tpu.vector_store %arg18[%70, %c0_26], %69 {strides = array<i32>} : memref<16x16xf32, #tpu.memory_space<vmem>>, vector<1x16xf32>,
      %c9_i32 = arith.constant 9 : i32
      %72 = arith.index_cast %c9_i32 : i32 to index
      %73 = memref.load %arg2[%72] : memref<16xi32, #tpu.memory_space<smem>>
      %74 = arith.index_cast %73 : i32 to index
      %c0_27 = arith.constant 0 : index
      %75 = vector.load %arg17[%74, %c0_27] : memref<64x16xf32, #tpu.memory_space<vmem>>, vector<1x16xf32>
      %76 = arith.index_cast %c9_i32 : i32 to index
      %c0_28 = arith.constant 0 : index
      %77 = vector.load %arg18[%76, %c0_28] : memref<16x16xf32, #tpu.memory_space<vmem>>, vector<1x16xf32>
      tpu.vector_store %arg18[%76, %c0_28], %75 {strides = array<i32>} : memref<16x16xf32, #tpu.memory_space<vmem>>, vector<1x16xf32>,
      %c10_i32 = arith.constant 10 : i32
      %78 = arith.index_cast %c10_i32 : i32 to index
      %79 = memref.load %arg2[%78] : memref<16xi32, #tpu.memory_space<smem>>
      %80 = arith.index_cast %79 : i32 to index
      %c0_29 = arith.constant 0 : index
      %81 = vector.load %arg17[%80, %c0_29] : memref<64x16xf32, #tpu.memory_space<vmem>>, vector<1x16xf32>
      %82 = arith.index_cast %c10_i32 : i32 to index
      %c0_30 = arith.constant 0 : index
      %83 = vector.load %arg18[%82, %c0_30] : memref<16x16xf32, #tpu.memory_space<vmem>>, vector<1x16xf32>
      tpu.vector_store %arg18[%82, %c0_30], %81 {strides = array<i32>} : memref<16x16xf32, #tpu.memory_space<vmem>>, vector<1x16xf32>,
      %c11_i32 = arith.constant 11 : i32
      %84 = arith.index_cast %c11_i32 : i32 to index
      %85 = memref.load %arg2[%84] : memref<16xi32, #tpu.memory_space<smem>>
      %86 = arith.index_cast %85 : i32 to index
      %c0_31 = arith.constant 0 : index
      %87 = vector.load %arg17[%86, %c0_31] : memref<64x16xf32, #tpu.memory_space<vmem>>, vector<1x16xf32>
      %88 = arith.index_cast %c11_i32 : i32 to index
      %c0_32 = arith.constant 0 : index
      %89 = vector.load %arg18[%88, %c0_32] : memref<16x16xf32, #tpu.memory_space<vmem>>, vector<1x16xf32>
      tpu.vector_store %arg18[%88, %c0_32], %87 {strides = array<i32>} : memref<16x16xf32, #tpu.memory_space<vmem>>, vector<1x16xf32>,
      %c12_i32 = arith.constant 12 : i32
      %90 = arith.index_cast %c12_i32 : i32 to index
      %91 = memref.load %arg2[%90] : memref<16xi32, #tpu.memory_space<smem>>
      %92 = arith.index_cast %91 : i32 to index
      %c0_33 = arith.constant 0 : index
      %93 = vector.load %arg17[%92, %c0_33] : memref<64x16xf32, #tpu.memory_space<vmem>>, vector<1x16xf32>
      %94 = arith.index_cast %c12_i32 : i32 to index
      %c0_34 = arith.constant 0 : index
      %95 = vector.load %arg18[%94, %c0_34] : memref<16x16xf32, #tpu.memory_space<vmem>>, vector<1x16xf32>
      tpu.vector_store %arg18[%94, %c0_34], %93 {strides = array<i32>} : memref<16x16xf32, #tpu.memory_space<vmem>>, vector<1x16xf32>,
      %c13_i32 = arith.constant 13 : i32
      %96 = arith.index_cast %c13_i32 : i32 to index
      %97 = memref.load %arg2[%96] : memref<16xi32, #tpu.memory_space<smem>>
      %98 = arith.index_cast %97 : i32 to index
      %c0_35 = arith.constant 0 : index
      %99 = vector.load %arg17[%98, %c0_35] : memref<64x16xf32, #tpu.memory_space<vmem>>, vector<1x16xf32>
      %100 = arith.index_cast %c13_i32 : i32 to index
      %c0_36 = arith.constant 0 : index
      %101 = vector.load %arg18[%100, %c0_36] : memref<16x16xf32, #tpu.memory_space<vmem>>, vector<1x16xf32>
      tpu.vector_store %arg18[%100, %c0_36], %99 {strides = array<i32>} : memref<16x16xf32, #tpu.memory_space<vmem>>, vector<1x16xf32>,
      %c14_i32 = arith.constant 14 : i32
      %102 = arith.index_cast %c14_i32 : i32 to index
      %103 = memref.load %arg2[%102] : memref<16xi32, #tpu.memory_space<smem>>
      %104 = arith.index_cast %103 : i32 to index
      %c0_37 = arith.constant 0 : index
      %105 = vector.load %arg17[%104, %c0_37] : memref<64x16xf32, #tpu.memory_space<vmem>>, vector<1x16xf32>
      %106 = arith.index_cast %c14_i32 : i32 to index
      %c0_38 = arith.constant 0 : index
      %107 = vector.load %arg18[%106, %c0_38] : memref<16x16xf32, #tpu.memory_space<vmem>>, vector<1x16xf32>
      tpu.vector_store %arg18[%106, %c0_38], %105 {strides = array<i32>} : memref<16x16xf32, #tpu.memory_space<vmem>>, vector<1x16xf32>,
      %c15_i32 = arith.constant 15 : i32
      %108 = arith.index_cast %c15_i32 : i32 to index
      %109 = memref.load %arg2[%108] : memref<16xi32, #tpu.memory_space<smem>>
      %110 = arith.index_cast %109 : i32 to index
      %c0_39 = arith.constant 0 : index
      %111 = vector.load %arg17[%110, %c0_39] : memref<64x16xf32, #tpu.memory_space<vmem>>, vector<1x16xf32>
      %112 = arith.index_cast %c15_i32 : i32 to index
      %c0_40 = arith.constant 0 : index
      %113 = vector.load %arg18[%112, %c0_40] : memref<16x16xf32, #tpu.memory_space<vmem>>, vector<1x16xf32>
      tpu.vector_store %arg18[%112, %c0_40], %111 {strides = array<i32>} : memref<16x16xf32, #tpu.memory_space<vmem>>, vector<1x16xf32>,
      %c16_i32 = arith.constant 16 : i32
      %c0_41 = arith.constant 0 : index
      %c0_42 = arith.constant 0 : index
      %114 = vector.load %arg18[%c0_41, %c0_42] : memref<16x16xf32, #tpu.memory_space<vmem>>, vector<16x16xf32>
      %115 = arith.truncf %114 : vector<16x16xf32> to vector<16x16xbf16>
      %c0_43 = arith.constant 0 : index
      %c0_44 = arith.constant 0 : index
      %116 = vector.load %arg10[%c0_43, %c0_44] : memref<16x32xbf16, #tpu.memory_space<vmem>>, vector<16x32xbf16>
      %cst = arith.constant dense<0.000000e+00> : vector<16x32xf32>
      %117 = tpu.matmul %115, %116, %cst {dimension_numbers = #tpu.dot_dimension_numbers<[1], [0], [0], [1], [0, 0, 1, 1], [], []>} : vector<16x16xbf16>, vector<16x32xbf16>, vector<16x32xf32> -> vector<16x32xf32>
      %c0_45 = arith.constant 0 : index
      %c0_46 = arith.constant 0 : index
      %118 = vector.load %arg5[%c0_45, %c0_46] : memref<16x16xbf16, #tpu.memory_space<vmem>>, vector<16x16xbf16>
      %c0_47 = arith.constant 0 : index
      %c0_48 = arith.constant 0 : index
      %119 = vector.load %arg11[%c0_47, %c0_48] : memref<16x32xbf16, #tpu.memory_space<vmem>>, vector<16x32xbf16>
      %cst_49 = arith.constant dense<0.000000e+00> : vector<16x32xf32>
      %120 = tpu.matmul %118, %119, %cst_49 {dimension_numbers = #tpu.dot_dimension_numbers<[1], [0], [0], [1], [0, 0, 1, 1], [], []>} : vector<16x16xbf16>, vector<16x32xbf16>, vector<16x32xf32> -> vector<16x32xf32>
      %121 = arith.addf %117, %120 : vector<16x32xf32>
      %c0_50 = arith.constant 0 : index
      %c0_51 = arith.constant 0 : index
      %122 = vector.load %arg12[%c0_50, %c0_51] : memref<1x32xf32, #tpu.memory_space<vmem>>, vector<1x32xf32>
      %123 = vector.broadcast %122 : vector<1x32xf32> to vector<16x32xf32>
      %124 = arith.addf %121, %123 : vector<16x32xf32>
      %cst_52 = arith.constant 0.000000e+00 : f32
      %125 = vector.broadcast %cst_52 : f32 to vector<16x32xf32>
      %126 = arith.maximumf %124, %125 : vector<16x32xf32>
      %c0_53 = arith.constant 0 : index
      %c0_54 = arith.constant 0 : index
      %127 = vector.load %arg13[%c0_53, %c0_54] : memref<1x32xf32, #tpu.memory_space<vmem>>, vector<1x32xf32>
      %128 = vector.broadcast %127 : vector<1x32xf32> to vector<16x32xf32>
      %129 = arith.mulf %126, %128 : vector<16x32xf32>
      %cst_55 = arith.constant dense<0.000000e+00> : vector<16xf32>
      %130 = vector.multi_reduction <add>, %129, %cst_55 [1] : vector<16x32xf32> to vector<16xf32>
      %131 = vector.shape_cast %130 : vector<16xf32> to vector<16x1xf32>
      %c0_56 = arith.constant 0 : index
      %c0_57 = arith.constant 0 : index
      %132 = vector.load %arg14[%c0_56, %c0_57] : memref<1x1xf32, #tpu.memory_space<vmem>>, vector<1x1xf32>
      %133 = vector.broadcast %132 : vector<1x1xf32> to vector<16x1xf32>
      %134 = arith.addf %131, %133 : vector<16x1xf32>
      %135 = arith.negf %134 : vector<16x1xf32>
      %136 = math.exp %135 : vector<16x1xf32>
      %cst_58 = arith.constant 1.000000e+00 : f32
      %137 = vector.broadcast %cst_58 : f32 to vector<16x1xf32>
      %138 = arith.addf %137, %136 : vector<16x1xf32>
      %139 = arith.divf %137, %138 : vector<16x1xf32>
      %c0_59 = arith.constant 0 : index
      %c0_60 = arith.constant 0 : index
      %140 = vector.load %arg15[%c0_59, %c0_60] : memref<16x1xf32, #tpu.memory_space<vmem>>, vector<16x1xf32>
      tpu.vector_store %arg15[%c0_59, %c0_60], %139 {strides = array<i32>} : memref<16x1xf32, #tpu.memory_space<vmem>>, vector<16x1xf32>,
    } else {
    }
    return
  }
  func.func @transform_0(%arg0: i32, %arg1: i32, %arg2: memref<16xi32, #tpu.memory_space<smem>>) -> (i32, i32) {
    %c0_i32 = arith.constant 0 : i32
    %c0_i32_0 = arith.constant 0 : i32
    return %arg1, %c0_i32 : i32, i32
  }
  func.func @transform_1(%arg0: i32, %arg1: i32, %arg2: memref<16xi32, #tpu.memory_space<smem>>) -> (i32, i32) {
    %c0_i32 = arith.constant 0 : i32
    %c0_i32_0 = arith.constant 0 : i32
    %c0_i32_1 = arith.constant 0 : i32
    return %c0_i32, %c0_i32_0 : i32, i32
  }
  func.func @transform_2(%arg0: i32, %arg1: i32, %arg2: memref<16xi32, #tpu.memory_space<smem>>) -> (i32, i32) {
    %c0_i32 = arith.constant 0 : i32
    %c0_i32_0 = arith.constant 0 : i32
    %c0_i32_1 = arith.constant 0 : i32
    return %c0_i32, %c0_i32_0 : i32, i32
  }
  func.func @transform_3(%arg0: i32, %arg1: i32, %arg2: memref<16xi32, #tpu.memory_space<smem>>) -> (i32, i32) {
    %c0_i32 = arith.constant 0 : i32
    %c0_i32_0 = arith.constant 0 : i32
    %c0_i32_1 = arith.constant 0 : i32
    return %c0_i32, %c0_i32_0 : i32, i32
  }
  func.func @transform_4(%arg0: i32, %arg1: i32, %arg2: memref<16xi32, #tpu.memory_space<smem>>) -> (i32, i32) {
    %c0_i32 = arith.constant 0 : i32
    %c0_i32_0 = arith.constant 0 : i32
    %c0_i32_1 = arith.constant 0 : i32
    return %c0_i32, %c0_i32_0 : i32, i32
  }
  func.func @transform_5(%arg0: i32, %arg1: i32, %arg2: memref<16xi32, #tpu.memory_space<smem>>) -> (i32, i32) {
    %c0_i32 = arith.constant 0 : i32
    %c0_i32_0 = arith.constant 0 : i32
    %c0_i32_1 = arith.constant 0 : i32
    return %c0_i32, %c0_i32_0 : i32, i32
  }
  func.func @transform_6(%arg0: i32, %arg1: i32, %arg2: memref<16xi32, #tpu.memory_space<smem>>) -> (i32, i32) {
    %c0_i32 = arith.constant 0 : i32
    %c0_i32_0 = arith.constant 0 : i32
    %c0_i32_1 = arith.constant 0 : i32
    return %c0_i32, %c0_i32_0 : i32, i32
  }
  func.func @transform_7(%arg0: i32, %arg1: i32, %arg2: memref<16xi32, #tpu.memory_space<smem>>) -> (i32, i32) {
    %c0_i32 = arith.constant 0 : i32
    %c0_i32_0 = arith.constant 0 : i32
    %c0_i32_1 = arith.constant 0 : i32
    return %c0_i32, %c0_i32_0 : i32, i32
  }
  func.func @transform_8(%arg0: i32, %arg1: i32, %arg2: memref<16xi32, #tpu.memory_space<smem>>) -> (i32, i32) {
    %c0_i32 = arith.constant 0 : i32
    %c0_i32_0 = arith.constant 0 : i32
    %c0_i32_1 = arith.constant 0 : i32
    return %c0_i32, %c0_i32_0 : i32, i32
  }
  func.func @transform_9(%arg0: i32, %arg1: i32, %arg2: memref<16xi32, #tpu.memory_space<smem>>) -> (i32, i32) {
    %c0_i32 = arith.constant 0 : i32
    %c0_i32_0 = arith.constant 0 : i32
    %c0_i32_1 = arith.constant 0 : i32
    return %c0_i32, %c0_i32_0 : i32, i32
  }
  func.func @transform_10(%arg0: i32, %arg1: i32, %arg2: memref<16xi32, #tpu.memory_space<smem>>) -> (i32, i32) {
    %c0_i32 = arith.constant 0 : i32
    %c0_i32_0 = arith.constant 0 : i32
    %c0_i32_1 = arith.constant 0 : i32
    return %c0_i32, %c0_i32_0 : i32, i32
  }
  func.func @transform_11(%arg0: i32, %arg1: i32, %arg2: memref<16xi32, #tpu.memory_space<smem>>) -> (i32, i32) {
    %c0_i32 = arith.constant 0 : i32
    %c0_i32_0 = arith.constant 0 : i32
    %c0_i32_1 = arith.constant 0 : i32
    return %c0_i32, %c0_i32_0 : i32, i32
  }
  func.func @transform_12(%arg0: i32, %arg1: i32, %arg2: memref<16xi32, #tpu.memory_space<smem>>) -> (i32, i32) {
    %c0_i32 = arith.constant 0 : i32
    %c0_i32_0 = arith.constant 0 : i32
    %c0_i32_1 = arith.constant 0 : i32
    return %c0_i32, %c0_i32_0 : i32, i32
  }
}

</mosaic_0001>

<bundles_post_ra>
// kernel: gcn_link_predictor_forward.1
= control target key start
LH: loop header
LB: loop body
LE: loop exit
PB: predicated region body
PF: predicated region fallthrough
CT: control target
= control target key end

     0   :  { %s1802_s0 = inlined_call_operand.vmem [shape: s32[16], index: 0, kind: input, shape index: {}]   ;;  %s1803_s1 = inlined_call_operand.vmem [shape: bf16[64,64], index: 1, kind: input, shape index: {}]   ;;  %s1804_s2 = inlined_call_operand.vmem [shape: bf16[64,16], index: 2, kind: input, shape index: {}]   ;;  %s1805_s3 = inlined_call_operand.vmem [shape: bf16[16,16], index: 3, kind: input, shape index: {}]   ;;  %s1806_s4 = inlined_call_operand.vmem [shape: bf16[16,32], index: 4, kind: input, shape index: {}]   ;;  %s1807_s5 = inlined_call_operand.vmem [shape: f32[1,32], index: 5, kind: input, shape index: {}]   ;;  %s1808_s6 = inlined_call_operand.vmem [shape: bf16[32,16], index: 6, kind: input, shape index: {}]   ;;  %s1809_s7 = inlined_call_operand.vmem [shape: f32[1,16], index: 7, kind: input, shape index: {}]   ;;  %s1810_s8 = inlined_call_operand.vmem [shape: bf16[16,32], index: 8, kind: input, shape index: {}]   ;;  %s1811_s9 = inlined_call_operand.vmem [shape: bf16[16,32], index: 9, kind: input, shape index: {}]   ;;  %s1812_s10 = inlined_call_operand.vmem [shape: f32[1,32], index: 10, kind: input, shape index: {}]   ;;  %s1813_s11 = inlined_call_operand.vmem [shape: f32[1,32], index: 11, kind: input, shape index: {}]   ;;  %s1814_s13 = inlined_call_operand.vmem [shape: f32[16,1], index: 13, kind: output, shape index: {}]   ;;  %s1815_s12 = inlined_call_operand.<no memory space> [shape: f32[1,1], index: 12, kind: input, shape index: {}]  }
   0x1   :  { %s18_s27 = sshll.u32 %s1802_s0, 4  ;;  %v22_v0 = vstv %s1815_s12  ;;  %s19_s27 = int_to_ptr.vmem [resolvable:$true] %s18_s27 }
   0x2   :  { %23 = vst [vmem:[#allocation7] sm:$0x1] %v22_v0  ;;  %s1529_s30 = scalar_lea.vmem %s19_s27, 16  ;;  %p1534_p1 = scmp.lt.s32.totalorder %s19_s27, %s19_s27 }
   0x3   :  { %p1530_p0 = scmp.ne.s32.totalorder %s19_s27, %s1529_s30  ;;  %p1535_p2 = scmp.lt.s32.totalorder %s1529_s30, %s1529_s30 }
   0x5   :  { %p1536_p3 = por %p1535_p2, %p1534_p1 }
   0x7   :  { %p1537_p4 = pnand %p1536_p3, %p1530_p0 }
   0x9   :  { %1540 = shalt.err (!%p1537_p4)  }
   0xa   :  { %s1567_s14 = smov [#allocation6]  }
   0xb   :  { %21 = dma.vmem_to_smem %s19_s27, 16, %s1567_s14, [#allocation5] }
   0xc   :  { %1553 = dma.done.wait [#allocation5], 16 }
   0xd   :  { %1554 = vsyncadd [#allocation5], 4294967280 }
   0xe   :  { %25 = sfence }
   0xf   :  { %s1647_s15 = smov 0   ;;  %s1649_s0 = smov 0  }
  0x10   :  { %s1651_s16 = smov 0  }
  0x11 LB: > { %s43_s12 = sadd.s32 1, %s1561_s0  ;;  %p1279_p5 = scmp.ge.s32.totalorder %s1565_s16, 1  ;;  %s1565_s16 = sphi %s1651_s16, %s31_s16   ;;  %s1561_s0 = sphi %s1649_s0, %s1817_s0   ;;  %s1557_s15 = sphi %s1647_s15, %s1816_s15  }
  0x12   : > { %p45_p6 = scmp.ge.s32.totalorder %s43_s12, 2  ;;  %p379_p7 = scmp.lt.s32.totalorder %s1565_s16, 3 }
  0x14   : > { %s1819_s12 = smov (%p45_p6, %s43_s12), 0  ;;  %p380_p8 = pnand %p1279_p5, %p379_p7 }
  0x15   : > { %p424_p9 = scmp.eq.s32.totalorder (!%p380_p8), %s1557_s15, 0 }
  0x16   : > { %383 = sbr.rel (%p380_p8) target bundleno = 1312 (0x520), region = 68 }
  0x1b   : > { %429 = sbr.rel (!%p424_p9) target bundleno = 32 (0x20), region = 72  ;;  %vm430_vm0 = vcmask (%p424_p9), 7168   ;;  %v1568_v1 = vmov (%p424_p9), 0.0  }
  0x1c   : > { %431 = vst.msk [vmem:[%s1814_s13] sm:$0xff] (%p424_p9), %vm430_vm0, %v1568_v1  ;;  %432 = vst.msk [vmem:[%s1814_s13 + $0x8] sm:$0xff] (%p424_p9), %vm430_vm0, %v1568_v1 }
  0x20 PF: > { %p1281_p10 = scmp.ne.s32.totalorder %s1557_s15, 0 }
  0x22   : > { %435 = sbr.rel (%p1281_p10) target bundleno = 674 (0x2a2), region = 76 }
  0x27   : > { %v1499_v2 = vld [vmem:[%s1804_s2 + $0x18] sm:$0xff]   ;;  %v1500_v3 = vld [vmem:[%s1804_s2 + $0x10] sm:$0xff]   ;;  %v1501_v4 = vld [vmem:[%s1804_s2 + $0x8] sm:$0xff]   ;;  %vm496_vm1 = vcmask 523264   ;;  %vm593_vm2 = vcmask 130048   ;;  %vm699_vm3 = vcmask 261120  }
  0x28   : > { %1397 = vmatprep.subr.bf16.mxu0 %v1499_v2  ;;  %v1503_v5 = vld [vmem:[%s1803_s1] sm:$0xff]   ;;  %v1504_v7 = vld [vmem:[%s1803_s1 + $0x8] sm:$0xff]   ;;  %v1505_v8 = vld [vmem:[%s1803_s1 + $0x10] sm:$0xff]   ;;  %vm813_vm4 = vcmask 125952  }
  0x29   : > { %1398 = vmatpush3.bf16.msra.mxu0 %v1499_v2  ;;  %1405 = vmatprep.mubr.msk.bf16.mxu0 %vm496_vm1, %v1503_v5  ;;  %v1502_v6 = vld [vmem:[%s1804_s2] sm:$0xff]   ;;  %v1506_v9 = vld [vmem:[%s1803_s1 + $0x18] sm:$0xff]   ;;  %v1508_v11 = vld [vmem:[%s1808_s6 + $0x8] sm:$0xff]  }
  0x2a   : > { %1399 = vmatprep.subr.bf16.mxu0 %v1500_v3  ;;  %v1507_v10 = vld [vmem:[%s1806_s4] sm:$0xff]  }
  0x2b   : > { %1413 = vmatprep.subr.bf16.mxu1 %v1507_v10  ;;  %v1509_v24 = vld [vmem:[%s1808_s6] sm:$0xff]  }
  0x2c   : > { %1414 = vmatpush3.bf16.msra.mxu1 %v1507_v10  ;;  %v1294_v27 = vld [vmem:[%s1807_s5] ss:$0 sm:$0xff] }
  0x2d   : > { %1400 = vmatpush3.bf16.msra.mxu0 %v1500_v3  ;;  %1423 = vmatprep.subr.bf16.mxu1 %v1508_v11 }
  0x2e   : > { %1401 = vmatprep.subr.bf16.mxu0 %v1501_v4 }
  0x31   : > { %1402 = vmatpush3.bf16.msra.mxu0 %v1501_v4 }
  0x32   : > { %1403 = vmatprep.subr.bf16.mxu0 %v1502_v6 }
  0x35   : > { %1404 = vmatpush3.bf16.msra.mxu0 %v1502_v6 }
  0x38   : > { %1406 = vmatmul.mubr.msk.bf16.vlgmr.msra.gmra.mxu0 %vm496_vm1, %v1504_v7 }
  0x39   : > { %1409 = vmatprep.mubr.msk.bf16.mxu0 %vm496_vm1, %v1505_v8 }
  0x40   : > { %1410 = vmatmul.mubr.msk.bf16.gmra.mxu0 %vm496_vm1, %v1506_v9 }
  0xf8   : > { %v1407_v12 = vpop.f32.mrf.mxu0 }
  0xfa   : > { %v543_v13 = vpop.f32.mrf.mxu0 }
  0xfc   : > { %v1408_v14 = vpop.f32.mrf.mxu0 }
  0xfd   : > { %v575_v17 = vpack.c.bf16 %v1408_v14, %v1407_v12 }
  0xfe   : > { %v546_v15 = vpop.f32.mrf.mxu0 }
  0xff   : > { %v574_v16 = vpack.c.bf16 %v546_v15, %v543_v13 }
 0x100   : > { %v1411_v18 = vpop.f32.mrf.mxu0 }
 0x101   : > { %1415 = vmatprep.mubr.msk.bf16.mxu1 %vm593_vm2, %v574_v16 }
 0x102   : > { %v559_v19 = vpop.f32.mrf.mxu0  ;;  %1416 = vmatmul.mubr.msk.bf16.vlgmr.msra.gmra.mxu1 %vm593_vm2, %v575_v17 }
 0x103   : > { %1424 = vmatpush3.bf16.msra.mxu1 %v1508_v11 }
 0x104   : > { %v1412_v20 = vpop.f32.mrf.mxu0  ;;  %1425 = vmatprep.subr.bf16.mxu1 %v1509_v24 }
 0x105   : > { %v577_v23 = vpack.c.bf16 %v1412_v20, %v1411_v18 }
 0x106   : > { %v562_v21 = vpop.f32.mrf.mxu0 }
 0x107   : > { %v576_v22 = vpack.c.bf16 %v562_v21, %v559_v19  ;;  %1426 = vmatpush3.bf16.msra.mxu1 %v1509_v24 }
 0x109   : > { %1419 = vmatprep.mubr.msk.bf16.mxu1 %vm593_vm2, %v576_v22 }
 0x10a   : > { %1420 = vmatmul.mubr.msk.bf16.gmra.mxu1 %vm593_vm2, %v577_v23 }
 0x1c2   : > { %v1417_v25 = vpop.f32.mrf.mxu1 }
 0x1c3   : > { %v649_v31 = vadd.f32 %v1417_v25, %v1294_v27 }
 0x1c4   : > { %v640_v26 = vpop.f32.mrf.mxu1 }
 0x1c5   : > { %v641_v29 = vadd.f32 %v1294_v27, %v640_v26  ;;  %v673_v38 = vmax.f32 %v649_v31, 0.0 }
 0x1c6   : > { %v1418_v28 = vpop.f32.mrf.mxu1 }
 0x1c7   : > { %v652_v30 = vadd.f32 %v1418_v28, %v1294_v27  ;;  %v671_v36 = vmax.f32 %v641_v29, 0.0 }
 0x1c8   : > { %v643_v32 = vpop.f32.mrf.mxu1 }
 0x1c9   : > { %v644_v33 = vadd.f32 %v1294_v27, %v643_v32  ;;  %v674_v34 = vmax.f32 %v652_v30, 0.0 }
 0x1ca   : > { %v1421_v35 = vpop.f32.mrf.mxu1 }
 0x1cb   : > { %v672_v37 = vmax.f32 %v644_v33, 0.0  ;;  %v680_v41 = vpack.c.bf16 %v674_v34, %v673_v38  ;;  %v665_v45 = vadd.f32 %v1421_v35, %v1294_v27 }
 0x1cc   : > { %v656_v39 = vpop.f32.mrf.mxu1 }
 0x1cd   : > { %v679_v40 = vpack.c.bf16 %v672_v37, %v671_v36  ;;  %v657_v43 = vadd.f32 %v1294_v27, %v656_v39  ;;  %v677_v51 = vmax.f32 %v665_v45, 0.0 }
 0x1ce   : > { %v1422_v42 = vpop.f32.mrf.mxu1 }
 0x1cf   : > { %v668_v44 = vadd.f32 %v1422_v42, %v1294_v27  ;;  %1427 = vmatprep.mubr.msk.bf16.mxu1 %vm699_vm3, %v679_v40  ;;  %v675_v49 = vmax.f32 %v657_v43, 0.0 }
 0x1d0   : > { %v659_v46 = vpop.f32.mrf.mxu1  ;;  %1428 = vmatmul.mubr.msk.bf16.vlgmr.msra.gmra.mxu1 %vm699_vm3, %v680_v41 }
 0x1d1   : > { %v660_v47 = vadd.f32 %v1294_v27, %v659_v46  ;;  %v678_v48 = vmax.f32 %v668_v44, 0.0 }
 0x1d3   : > { %v676_v50 = vmax.f32 %v660_v47, 0.0  ;;  %v682_v53 = vpack.c.bf16 %v678_v48, %v677_v51 }
 0x1d5   : > { %v681_v52 = vpack.c.bf16 %v676_v50, %v675_v49 }
 0x1d7   : > { %1431 = vmatprep.mubr.msk.bf16.mxu1 %vm699_vm3, %v681_v52 }
 0x1d8   : > { %1432 = vmatmul.mubr.msk.bf16.gmra.mxu1 %vm699_vm3, %v682_v53 }
 0x290   : > { %v1429_v54 = vpop.f32.mrf.mxu1 }
 0x291   : > { %v1359_v55 = vpack.c.bf16 %v1429_v54, %v1429_v54 }
 0x292   : > { %v746_v56 = vpop.f32.mrf.mxu1 }
 0x293   : > { %816 = vst.msk [vmem:[#allocation2 + $0x8] sm:$0xf] %vm813_vm4, %v1359_v55  ;;  %v1357_v57 = vpack.c.bf16 %v746_v56, %v746_v56 }
 0x294   : > { %v1430_v58 = vpop.f32.mrf.mxu1 }
 0x295   : > { %814 = vst.msk [vmem:[#allocation2] sm:$0xf] %vm813_vm4, %v1357_v57  ;;  %v1360_v59 = vpack.c.bf16 %v1430_v58, %v1430_v58 }
 0x296   : > { %v749_v60 = vpop.f32.mrf.mxu1 }
 0x297   : > { %817 = vst.msk [vmem:[#allocation2 + $0xc] sm:$0xf] %vm813_vm4, %v1360_v59  ;;  %v1358_v61 = vpack.c.bf16 %v749_v60, %v749_v60 }
 0x298   : > { %v1433_v62 = vpop.f32.mrf.mxu1 }
 0x299   : > { %815 = vst.msk [vmem:[#allocation2 + $0x4] sm:$0xf] %vm813_vm4, %v1358_v61  ;;  %v1363_v63 = vpack.c.bf16 %v1433_v62, %v1433_v62 }
 0x29a   : > { %v762_v0 = vpop.f32.mrf.mxu1 }
 0x29b   : > { %820 = vst.msk [vmem:[#allocation2 + $0x18] sm:$0xf] %vm813_vm4, %v1363_v63  ;;  %v1361_v1 = vpack.c.bf16 %v762_v0, %v762_v0 }
 0x29c   : > { %v1434_v2 = vpop.f32.mrf.mxu1 }
 0x29d   : > { %818 = vst.msk [vmem:[#allocation2 + $0x10] sm:$0xf] %vm813_vm4, %v1361_v1  ;;  %v1364_v3 = vpack.c.bf16 %v1434_v2, %v1434_v2 }
 0x29e   : > { %v765_v4 = vpop.f32.mrf.mxu1 }
 0x29f   : > { %821 = vst.msk [vmem:[#allocation2 + $0x1c] sm:$0xf] %vm813_vm4, %v1364_v3  ;;  %v1362_v5 = vpack.c.bf16 %v765_v4, %v765_v4 }
 0x2a1   : > { %819 = vst.msk [vmem:[#allocation2 + $0x14] sm:$0xf] %vm813_vm4, %v1362_v5 }
 0x2a2 PF: > { %p822_p11 = scmp.eq.s32.totalorder %s1557_s15, 1  ;;  %p1314_p12 = scmp.ne.s32.totalorder %s1557_s15, 1 }
 0x2a4   : > { %825 = sbr.rel (%p1314_p12) target bundleno = 900 (0x384), region = 80 }
 0x2a9   : > { %v1510_v6 = vld [vmem:[#allocation2 + $0x18] sm:$0xff]   ;;  %v1511_v7 = vld [vmem:[#allocation2 + $0x10] sm:$0xff]   ;;  %v1512_v8 = vld [vmem:[#allocation2 + $0x8] sm:$0xff]   ;;  %vm893_vm5 = vcmask 523264   ;;  %vm972_vm6 = vcmask 130048  }
 0x2aa   : > { %1435 = vmatprep.subr.bf16.mxu0 %v1510_v6  ;;  %1463 = vmatprep.subr.bf16.mxu1 %v1510_v6  ;;  %v1514_v9 = vld [vmem:[%s1803_s1] sm:$0xff]   ;;  %v1515_v10 = vld [vmem:[%s1803_s1 + $0x10] sm:$0xff]   ;;  %v1516_v12 = vld [vmem:[%s1803_s1 + $0x8] sm:$0xff]  }
 0x2ab   : > { %1436 = vmatpush3.bf16.msra.mxu0 %v1510_v6  ;;  %1467 = vmatpush3.bf16.msra.mxu1 %v1510_v6  ;;  %v1513_v11 = vld [vmem:[#allocation2] sm:$0xff]   ;;  %v1517_v13 = vld [vmem:[%s1803_s1 + $0x18] sm:$0xff]  }
 0x2ac   : > { %1437 = vmatprep.subr.bf16.mxu0 %v1511_v7  ;;  %1464 = vmatprep.subr.bf16.mxu1 %v1511_v7  ;;  %v1315_v14 = vld [vmem:[%s1809_s7] ss:$0 sm:$0xff] }
 0x2ad   : > { %1443 = vmatprep.mubr.msk.bf16.mxu0 %vm893_vm5, %v1514_v9  ;;  %1447 = vmatprep.mubr.msk.bf16.mxu1 %vm893_vm5, %v1515_v10 }
 0x2af   : > { %1438 = vmatpush3.bf16.msra.mxu0 %v1511_v7  ;;  %1468 = vmatpush3.bf16.msra.mxu1 %v1511_v7 }
 0x2b0   : > { %1439 = vmatprep.subr.bf16.mxu0 %v1512_v8  ;;  %1465 = vmatprep.subr.bf16.mxu1 %v1512_v8 }
 0x2b3   : > { %1440 = vmatpush3.bf16.msra.mxu0 %v1512_v8  ;;  %1469 = vmatpush3.bf16.msra.mxu1 %v1512_v8 }
 0x2b4   : > { %1441 = vmatprep.subr.bf16.mxu0 %v1513_v11  ;;  %1466 = vmatprep.subr.bf16.mxu1 %v1513_v11 }
 0x2b7   : > { %1442 = vmatpush3.bf16.msra.mxu0 %v1513_v11  ;;  %1470 = vmatpush3.bf16.msra.mxu1 %v1513_v11 }
 0x2ba   : > { %1444 = vmatmul.mubr.msk.bf16.vlgmr.msra.gmra.mxu0 %vm893_vm5, %v1516_v12  ;;  %1448 = vmatmul.mubr.msk.bf16.vlgmr.msra.gmra.mxu1 %vm893_vm5, %v1517_v13 }
 0x37a   : > { %v1445_v15 = vpop.f32.mrf.mxu0  ;;  %v1449_v16 = vpop.f32.mrf.mxu1 }
 0x37b   : > { %v949_v17 = vadd.f32 %v1445_v15, %v1315_v14  ;;  %v965_v18 = vadd.f32 %v1449_v16, %v1315_v14 }
 0x37c   : > { %v940_v19 = vpop.f32.mrf.mxu0  ;;  %v956_v20 = vpop.f32.mrf.mxu1 }
 0x37d   : > { %975 = vst.msk [vmem:[#allocation3 + $0x10] sm:$0xff] %vm972_vm6, %v949_v17  ;;  %979 = vst.msk [vmem:[#allocation3 + $0x30] sm:$0xff] %vm972_vm6, %v965_v18  ;;  %v941_v21 = vadd.f32 %v1315_v14, %v940_v19  ;;  %v957_v22 = vadd.f32 %v1315_v14, %v956_v20 }
 0x37e   : > { %v1446_v23 = vpop.f32.mrf.mxu0  ;;  %v1450_v24 = vpop.f32.mrf.mxu1 }
 0x37f   : > { %973 = vst.msk [vmem:[#allocation3] sm:$0xff] %vm972_vm6, %v941_v21  ;;  %977 = vst.msk [vmem:[#allocation3 + $0x20] sm:$0xff] %vm972_vm6, %v957_v22  ;;  %v952_v25 = vadd.f32 %v1446_v23, %v1315_v14  ;;  %v968_v26 = vadd.f32 %v1450_v24, %v1315_v14 }
 0x380   : > { %v943_v27 = vpop.f32.mrf.mxu0  ;;  %v959_v28 = vpop.f32.mrf.mxu1 }
 0x381   : > { %976 = vst.msk [vmem:[#allocation3 + $0x18] sm:$0xff] %vm972_vm6, %v952_v25  ;;  %980 = vst.msk [vmem:[#allocation3 + $0x38] sm:$0xff] %vm972_vm6, %v968_v26  ;;  %v944_v29 = vadd.f32 %v1315_v14, %v943_v27  ;;  %v960_v30 = vadd.f32 %v1315_v14, %v959_v28 }
 0x383   : > { %974 = vst.msk [vmem:[#allocation3 + $0x8] sm:$0xff] %vm972_vm6, %v944_v29  ;;  %978 = vst.msk [vmem:[#allocation3 + $0x28] sm:$0xff] %vm972_vm6, %v960_v30 }
 0x384 PF: > { %984 = sbr.rel (!%p822_p11) target bundleno = 1312 (0x520), region = 84  ;;  %v1518_v31 = vld [vmem:[%s1811_s9] sm:$0xff] (%p822_p11)   ;;  %v1569_v32 = vmov (%p822_p11), 0.0   ;;  %vm1570_vm7 = vmmov (%p822_p11), 0   ;;  %vm1070_vm8 = vcmask (%p822_p11), 130048   ;;  %s985_s15 = sld [smem:[#allocation6]] (%p822_p11) }
 0x385   : > { %1451 = vmatprep.subr.bf16.mxu0 (%p822_p11), %v1569_v32  ;;  %v1519_v33 = vld [vmem:[%s1805_s3] sm:$0xff] (%p822_p11)   ;;  %1457 = vmatprep.subr.bf16.mxu1 (%p822_p11), %v1569_v32  ;;  %s1329_s14 = sld [smem:[#allocation6 + $0x1]] (%p822_p11)  ;;  %vm988_vm9 = vcmask (%p822_p11), 122880   ;;  %vm1185_vm10 = vcmask (%p822_p11), 261120   ;;  %v1351_v10 = vld [vmem:[#allocation7] ss:$0 sm:$0xff] (%p822_p11) }
 0x386   : > { %1452 = vmatpush3.bf16.msra.mxu0 (%p822_p11), %v1518_v31  ;;  %1453 = vmatprep.mubr.msk.bf16.mxu0 (%p822_p11), %vm1570_vm7, %v1569_v32  ;;  %v1520_v34 = vld [vmem:[%s1810_s8] sm:$0xff] (%p822_p11)   ;;  %s1330_s17 = sld [smem:[#allocation6 + $0x2]] (%p822_p11)  ;;  %vm1213_vm11 = vcmask (%p822_p11), 7168  }
 0x387   : > { %1459 = vmatprep.mubr.msk.bf16.mxu1 (%p822_p11), %vm1570_vm7, %v1569_v32  ;;  %1458 = vmatpush3.bf16.msra.mxu1 (%p822_p11), %v1520_v34  ;;  %s1331_s18 = sld [smem:[#allocation6 + $0x3]] (%p822_p11)  ;;  %v1349_v59 = vld [vmem:[%s1812_s10] ss:$0 sm:$0xff] (%p822_p11) }
 0x388   : > { %s1332_s19 = sld [smem:[#allocation6 + $0x4]] (%p822_p11)  ;;  %v1350_v0 = vld [vmem:[%s1813_s11] ss:$0 sm:$0xff] (%p822_p11) }
 0x389   : > { %1454 = vmatmul.mubr.msk.bf16.vlgmr.msra.gmra.mxu0 %vm1070_vm8, %v1519_v33  ;;  %s1333_s20 = sld [smem:[#allocation6 + $0x5]] }
 0x38a   : > { %s1334_s21 = sld [smem:[#allocation6 + $0x6]]  ;;  %s986_s22 = scalar_lea.vmem [#allocation3], %s985_s15 }
 0x38b   : > { %v987_v35 = vld [vmem:[%s986_s22] sm:$0x1]  ;;  %s1335_s23 = sld [smem:[#allocation6 + $0x7]]  ;;  %s991_s24 = scalar_lea.vmem [#allocation3], %s1329_s14 }
 0x38c   : > { %989 = vst.msk [vmem:[#allocation4] sm:$0x1] %vm988_vm9, %v987_v35  ;;  %v992_v36 = vld [vmem:[%s991_s24] sm:$0x1]  ;;  %s1336_s25 = sld [smem:[#allocation6 + $0x8]]  ;;  %s995_s26 = scalar_lea.vmem [#allocation3], %s1330_s17 }
 0x38d   : > { %993 = vst.msk [vmem:[#allocation4 + $0x1] sm:$0x1] %vm988_vm9, %v992_v36  ;;  %v996_v37 = vld [vmem:[%s995_s26] sm:$0x1]  ;;  %s1337_s27 = sld [smem:[#allocation6 + $0x9]]  ;;  %s999_s28 = scalar_lea.vmem [#allocation3], %s1331_s18 }
 0x38e   : > { %997 = vst.msk [vmem:[#allocation4 + $0x2] sm:$0x1] %vm988_vm9, %v996_v37  ;;  %v1000_v38 = vld [vmem:[%s999_s28] sm:$0x1]  ;;  %s1338_s29 = sld [smem:[#allocation6 + $0xa]]  ;;  %s1003_s30 = scalar_lea.vmem [#allocation3], %s1332_s19 }
 0x38f   : > { %1001 = vst.msk [vmem:[#allocation4 + $0x3] sm:$0x1] %vm988_vm9, %v1000_v38  ;;  %v1004_v39 = vld [vmem:[%s1003_s30] sm:$0x1]  ;;  %s1339_s15 = sld [smem:[#allocation6 + $0xb]]  ;;  %s1007_s14 = scalar_lea.vmem [#allocation3], %s1333_s20 }
 0x390   : > { %1005 = vst.msk [vmem:[#allocation4 + $0x4] sm:$0x1] %vm988_vm9, %v1004_v39  ;;  %v1008_v40 = vld [vmem:[%s1007_s14] sm:$0x1]  ;;  %s1340_s22 = sld [smem:[#allocation6 + $0xc]]  ;;  %s1011_s17 = scalar_lea.vmem [#allocation3], %s1334_s21 }
 0x391   : > { %1009 = vst.msk [vmem:[#allocation4 + $0x5] sm:$0x1] %vm988_vm9, %v1008_v40  ;;  %v1012_v41 = vld [vmem:[%s1011_s17] sm:$0x1]  ;;  %s1341_s24 = sld [smem:[#allocation6 + $0xd]]  ;;  %s1015_s18 = scalar_lea.vmem [#allocation3], %s1335_s23 }
 0x392   : > { %1013 = vst.msk [vmem:[#allocation4 + $0x6] sm:$0x1] %vm988_vm9, %v1012_v41  ;;  %v1016_v42 = vld [vmem:[%s1015_s18] sm:$0x1]  ;;  %s1342_s26 = sld [smem:[#allocation6 + $0xe]]  ;;  %s1019_s19 = scalar_lea.vmem [#allocation3], %s1336_s25 }
 0x393   : > { %1017 = vst.msk [vmem:[#allocation4 + $0x7] sm:$0x1] %vm988_vm9, %v1016_v42  ;;  %v1020_v43 = vld [vmem:[%s1019_s19] sm:$0x1]  ;;  %s1343_s28 = sld [smem:[#allocation6 + $0xf]]  ;;  %s1023_s20 = scalar_lea.vmem [#allocation3], %s1337_s27 }
 0x394   : > { %1021 = vst.msk [vmem:[#allocation4 + $0x8] sm:$0x1] %vm988_vm9, %v1020_v43  ;;  %v1024_v44 = vld [vmem:[%s1023_s20] sm:$0x1]  ;;  %s1027_s30 = scalar_lea.vmem [#allocation3], %s1338_s29 }
 0x395   : > { %1025 = vst.msk [vmem:[#allocation4 + $0x9] sm:$0x1] %vm988_vm9, %v1024_v44  ;;  %v1028_v45 = vld [vmem:[%s1027_s30] sm:$0x1]  ;;  %s1031_s21 = scalar_lea.vmem [#allocation3], %s1339_s15 }
 0x396   : > { %1029 = vst.msk [vmem:[#allocation4 + $0xa] sm:$0x1] %vm988_vm9, %v1028_v45  ;;  %v1032_v46 = vld [vmem:[%s1031_s21] sm:$0x1]  ;;  %s1035_s23 = scalar_lea.vmem [#allocation3], %s1340_s22 }
 0x397   : > { %1033 = vst.msk [vmem:[#allocation4 + $0xb] sm:$0x1] %vm988_vm9, %v1032_v46  ;;  %v1036_v47 = vld [vmem:[%s1035_s23] sm:$0x1]  ;;  %s1039_s25 = scalar_lea.vmem [#allocation3], %s1341_s24 }
 0x398   : > { %1037 = vst.msk [vmem:[#allocation4 + $0xc] sm:$0x1] %vm988_vm9, %v1036_v47  ;;  %v1040_v48 = vld [vmem:[%s1039_s25] sm:$0x1]  ;;  %s1043_s27 = scalar_lea.vmem [#allocation3], %s1342_s26 }
 0x399   : > { %1041 = vst.msk [vmem:[#allocation4 + $0xd] sm:$0x1] %vm988_vm9, %v1040_v48  ;;  %v1044_v49 = vld [vmem:[%s1043_s27] sm:$0x1]  ;;  %s1047_s29 = scalar_lea.vmem [#allocation3], %s1343_s28 }
 0x39a   : > { %1045 = vst.msk [vmem:[#allocation4 + $0xe] sm:$0x1] %vm988_vm9, %v1044_v49  ;;  %v1048_v50 = vld [vmem:[%s1047_s29] sm:$0x1] }
 0x39b   : > { %1049 = vst.msk [vmem:[#allocation4 + $0xf] sm:$0x1] %vm988_vm9, %v1048_v50  ;;  %v1050_v51 = vld [vmem:[#allocation4] sm:$0xff] }
 0x3a2   : > { %v1051_v52 = vld [vmem:[#allocation4 + $0x8] sm:$0xff] }
 0x3a3   : > { %v1052_v53 = vpack.c.bf16 %v1051_v52, %v1050_v51 }
 0x3a5   : > { %1460 = vmatmul.mubr.msk.bf16.vlgmr.msra.gmra.mxu1 %vm1070_vm8, %v1052_v53 }
 0x449   : > { %v1108_v54 = vpop.f32.mrf.mxu0 }
 0x44b   : > { %v1455_v55 = vpop.f32.mrf.mxu0 }
 0x44d   : > { %v1111_v56 = vpop.f32.mrf.mxu0 }
 0x44f   : > { %v1456_v57 = vpop.f32.mrf.mxu0 }
 0x465   : > { %v1158_v58 = vpop.f32.mrf.mxu1 }
 0x466   : > { %v1159_v60 = vadd.f32 %v1158_v58, %v1108_v54 }
 0x467   : > { %v1461_v61 = vpop.f32.mrf.mxu1 }
 0x468   : > { %v1172_v62 = vadd.f32 %v1349_v59, %v1159_v60 }
 0x469   : > { %v1161_v63 = vpop.f32.mrf.mxu1 }
 0x46a   : > { %v1174_v1 = vmax.f32 %v1172_v62, 0.0  ;;  %v1162_v2 = vadd.f32 %v1161_v63, %v1111_v56 }
 0x46b   : > { %v1462_v3 = vpop.f32.mrf.mxu1 }
 0x46c   : > { %v1173_v4 = vadd.f32 %v1349_v59, %v1162_v2  ;;  %v1183_v5 = vmul.f32 %v1350_v0, %v1174_v1 }
 0x46e   : > { %v1175_v6 = vmax.f32 %v1173_v4, 0.0  ;;  %v1186_v7 = vsel %vm1185_vm10, %v1183_v5, 0.0 }
 0x46f   : > { %1187 = vadd.xlane.f32.xlu0 %v1186_v7 }
 0x470   : > { %v1184_v8 = vmul.f32 %v1350_v0, %v1175_v6 }
 0x472   : > { %v1189_v9 = vsel %vm1185_vm10, %v1184_v8, 0.0 }
 0x473   : > { %1190 = vadd.xlane.f32.xlu0 %v1189_v9 }
 0x4f8   : > { %v1188_v11 = vpop.xlane.xlu0 %1187 }
 0x4f9   : > { %v1199_v12 = vadd.f32 %v1351_v10, %v1188_v11 }
 0x4fb   : > { %v1352_v13 = vmul.f32 -1.442695, %v1199_v12 }
 0x4fc   : > { %v1191_v14 = vpop.xlane.xlu0 %1190 }
 0x4fd   : > { %1521 = vpow2.f32 %v1352_v13  ;;  %v1200_v15 = vadd.f32 %v1351_v10, %v1191_v14 }
 0x4ff   : > { %v1353_v16 = vmul.f32 -1.442695, %v1200_v15 }
 0x501   : > { %1523 = vpow2.f32 %v1353_v16 }
 0x50a   : > { %v1522_v17 = vpop.eup %1521 }
 0x50b   : > { %v1207_v18 = vadd.f32 1.0, %v1522_v17 }
 0x50d   : > { %1525 = vrcp.f32 %v1207_v18 }
 0x50e   : > { %v1524_v19 = vpop.eup %1523 }
 0x50f   : > { %v1208_v20 = vadd.f32 1.0, %v1524_v19 }
 0x511   : > { %1527 = vrcp.f32 %v1208_v20 }
 0x51a   : > { %v1526_v21 = vpop.eup %1525 }
 0x51b   : > { %1214 = vst.msk [vmem:[%s1814_s13] sm:$0xff] %vm1213_vm11, %v1526_v21 }
 0x51e   : > { %v1528_v22 = vpop.eup %1527 }
 0x51f   : > { %1215 = vst.msk [vmem:[%s1814_s13 + $0x8] sm:$0xff] %vm1213_vm11, %v1528_v22 }
 0x520 PF: > { %s31_s16 = sadd.s32 1, %s1565_s16   ;;  %s1816_s15 = smov %s1561_s0 }
 0x521   : > { %p28_p13 = scmp.ge.s32.totalorder %s31_s16, 4   ;;  %s1817_s0 = smov %s1819_s12 }
 0x523   :  { %30 = sbr.rel (!%p28_p13) target bundleno = 17 (0x11), region = 128 }

</bundles_post_ra>
